<compile_context>
chip_gen: v7x
topology: tpu7x:2x2x1
jax: 0.10.0
libtpu: 0.0.40
codegen_flags: <defaults>
</compile_context>

<pallas_src>
import functools

import jax
import jax.numpy as jnp
from jax import lax
from jax.experimental import pallas as pl
from jax.experimental.pallas import tpu as pltpu


def _round_up(x, m):
    return (x + m - 1) // m * m


def _cdiv(a, b):
    return (a + b - 1) // b


def edge_loss_kernel(rowv_ref, pred_ref, targ_ref, out_ref, *, w_valid):
    rowv = rowv_ref[...] != 0                      # (RB, 1) row validity
    x = pred_ref[...].astype(jnp.float32)          # (RB, Wp) logits
    # Zero the target on pad / ragged rows so the vertical rotate only ever
    # wraps zeros into valid rows (pad rows are already zero; ragged rows of
    # the last block may hold garbage).
    t = jnp.where(rowv, targ_ref[...].astype(jnp.float32), 0.0)

    rb, wp = t.shape

    # Sobel-y cross-correlation with zero padding, separable form.
    #   horizontal [1, 2, 1]:  s[i, j] = t[i, j-1] + 2*t[i, j] + t[i, j+1]
    # Whichever end each rotate wraps around either brings in a zero pad
    # column (Wp > W) or lands in a pad column that is masked below, so no
    # boundary masks are needed and the sum is direction-convention free.
    s = pltpu.roll(t, 1, 1) + pltpu.roll(t, wp - 1, 1) + 2.0 * t
    #   vertical [-1, 0, 1]:  conv[i, j] = +-(s[i+1, j] - s[i-1, j])
    # Same argument with the guaranteed zero pad rows between packed images;
    # the sign ambiguity is irrelevant because only |conv| > 0 is used.
    conv = pltpu.roll(s, 1, 0) - pltpu.roll(s, rb - 1, 0)

    # BCEWithLogitsLoss against edge = (|conv| > 0), numerically stable form,
    # with the edge mask and the validity mask fused into selects.
    col = lax.broadcasted_iota(jnp.int32, (1, wp), 1)
    valid = rowv & (col < w_valid)
    loss = (jnp.maximum(x, 0.0)
            - jnp.where(conv != 0.0, x, 0.0)
            + jnp.log(1.0 + jnp.exp(-jnp.abs(x))))
    partial = jnp.sum(jnp.where(valid, loss, 0.0))

    # Lane-dense per-step partial sum; the grid axis stays fully parallel --
    # the tiny final reduction happens in the wrapper.
    r = lax.broadcasted_iota(jnp.int32, (8, 128), 0)
    c = lax.broadcasted_iota(jnp.int32, (8, 128), 1)
    out_ref[...] = jnp.where((r == 0) & (c == 0), partial, 0.0)


def edge_loss(prediction, target, *, step_vmem_budget_bytes=24 << 20):
    """prediction, target: (N, 1, H, W). Returns the scalar mean BCE-with-logits
    between prediction and the Sobel-edge mask of target (EdgeLoss.forward)."""
    N, C, H, W = prediction.shape
    assert C == 1, "reference conv kernel is (1,1,3,3) -> single channel only"

    pred = prediction.reshape(N, H, W)   # keep native dtype on the wire
    targ = target.reshape(N, H, W)

    # Lane/sublane friendly layout with at least one zero pad row and column,
    # so the in-kernel rotates never need boundary masks.
    Hp = _round_up(H + 1, 8)
    Wp = _round_up(W + 1, 128)
    # TODO(synk): when W % 128 == 0 this pays an extra 128 pad columns (and a
    # jnp.pad HBM pass); a tridiagonal-matrix MXU horizontal pass would avoid
    # both for lane-aligned widths.
    pad = ((0, 0), (0, Hp - H), (0, Wp - W))
    pred = jnp.pad(pred, pad)
    targ = jnp.pad(targ, pad)

    # Merge batch and rows: every image occupies Hp rows (last Hp-H are zero),
    # so blocks are plain 2-D lane-dense tiles and vertical neighbours of valid
    # rows never cross an image boundary.
    pred2 = pred.reshape(N * Hp, Wp)
    targ2 = targ.reshape(N * Hp, Wp)

    # Images per grid step: budget counts double-buffered inputs, the lane-
    # padded row-mask block and ~5 live f32 full-block intermediates.
    in_bytes = prediction.dtype.itemsize + target.dtype.itemsize
    per_image = Hp * Wp * (2 * in_bytes + 5 * 4) + Hp * 2 * 4 * 128
    tb = max(1, min(N, step_vmem_budget_bytes // max(per_image, 1)))
    if N >= 2:
        tb = min(tb, _cdiv(N, 2))   # nb >= 2: keep both v7x TensorCores busy
    nb = _cdiv(N, tb)
    rb = tb * Hp
    # TODO(synk): a single image larger than the budget still becomes one
    # block; add row tiling with a 1-row halo for very large H*W.

    # Row validity: valid image row AND not past the ragged batch end.  The
    # ragged rows of the last block read unspecified data that this mask both
    # excludes from the loss and zeroes in the target.
    g = jnp.arange(nb * rb, dtype=jnp.int32)
    rowv = ((g < N * Hp) & ((g % Hp) < H)).astype(jnp.int32).reshape(nb * rb, 1)

    out = pl.pallas_call(
        functools.partial(edge_loss_kernel, w_valid=W),
        out_shape=jax.ShapeDtypeStruct((nb * 8, 128), jnp.float32),
        grid_spec=pltpu.PrefetchScalarGridSpec(
            num_scalar_prefetch=0,
            grid=(nb,),
            in_specs=[
                pl.BlockSpec((rb, 1), lambda b: (b, 0)),
                pl.BlockSpec((rb, Wp), lambda b: (b, 0)),
                pl.BlockSpec((rb, Wp), lambda b: (b, 0)),
            ],
            out_specs=pl.BlockSpec((8, 128), lambda b: (b, 0)),
        ),
        compiler_params=pltpu.CompilerParams(
            dimension_semantics=("parallel",),
            vmem_limit_bytes=48 * 1024 * 1024),
    )(rowv, pred2, targ2)
    return jnp.sum(out) / (N * C * H * W)


def _edge_loss_ref(prediction, target):
    """Pure-JAX reference for correctness check (matches the PyTorch module)."""
    k = jnp.array([[-1., -2., -1.], [0., 0., 0.], [1., 2., 1.]],
                  jnp.float32).reshape(1, 1, 3, 3)
    conv = lax.conv_general_dilated(
        target.astype(jnp.float32), k, window_strides=(1, 1),
        padding=((1, 1), (1, 1)),
        dimension_numbers=("NCHW", "OIHW", "NCHW"))
    edge = (jnp.abs(conv) > 0.0).astype(jnp.float32)
    x = prediction.astype(jnp.float32)
    loss = jnp.maximum(x, 0.0) - x * edge + jnp.log1p(jnp.exp(-jnp.abs(x)))
    return jnp.mean(loss)


if __name__ == "__main__":
    key = jax.random.PRNGKey(0)
    kp, kt = jax.random.split(key)
    N, C, H, W = 2, 1, 16, 16
    prediction = jax.random.normal(kp, (N, C, H, W), dtype=jnp.float32)
    target = (jax.random.uniform(kt, (N, C, H, W)) > 0.5).astype(jnp.float32)

    out = edge_loss(prediction, target)
    out = jax.block_until_ready(out)

    ref = _edge_loss_ref(prediction, target)
    assert jnp.allclose(out, ref, rtol=1e-5, atol=1e-5), (out, ref)

    print("KERNEL_OK")
</pallas_src>

<mosaic_0001>
module attributes {stable_mosaic.version = 11 : i64} {
  func.func @edge_loss_kernel(%arg0: i32, %arg1: memref<24x1xi32, #tpu.memory_space<vmem>>, %arg2: memref<24x128xf32, #tpu.memory_space<vmem>>, %arg3: memref<24x128xf32, #tpu.memory_space<vmem>>, %arg4: memref<8x128xf32, #tpu.memory_space<vmem>>) attributes {dimension_semantics = [#tpu.dimension_semantics<parallel>], iteration_bounds = array<i64: 2>, scalar_prefetch = 0 : i64, scratch_operands = 0 : i64, tpu.core_type = #tpu.core_type<tc>, window_params = [{transform_indices = @transform_0, window_bounds = array<i64: 24, 1>}, {transform_indices = @transform_1, window_bounds = array<i64: 24, 128>}, {transform_indices = @transform_2, window_bounds = array<i64: 24, 128>}, {transform_indices = @transform_3, window_bounds = array<i64: 8, 128>}]} {
    %c0 = arith.constant 0 : index
    %c0_0 = arith.constant 0 : index
    %0 = vector.load %arg1[%c0, %c0_0] : memref<24x1xi32, #tpu.memory_space<vmem>>, vector<24x1xi32>
    %c0_i32 = arith.constant 0 : i32
    %1 = vector.broadcast %c0_i32 : i32 to vector<24x1xi32>
    %2 = arith.cmpi ne, %0, %1 : vector<24x1xi32>
    %c0_1 = arith.constant 0 : index
    %c0_2 = arith.constant 0 : index
    %3 = vector.load %arg2[%c0_1, %c0_2] : memref<24x128xf32, #tpu.memory_space<vmem>>, vector<24x128xf32>
    %c0_3 = arith.constant 0 : index
    %c0_4 = arith.constant 0 : index
    %4 = vector.load %arg3[%c0_3, %c0_4] : memref<24x128xf32, #tpu.memory_space<vmem>>, vector<24x128xf32>
    %cst = arith.constant 0.000000e+00 : f32
    %5 = vector.shape_cast %2 : vector<24x1xi1> to vector<24x1xi1>
    %6 = vector.broadcast %5 : vector<24x1xi1> to vector<24x128xi1>
    %7 = vector.broadcast %cst : f32 to vector<24x128xf32>
    %8 = arith.select %6, %4, %7 : vector<24x128xi1>, vector<24x128xf32>
    %c1_i32 = arith.constant 1 : i32
    %9 = tpu.dynamic_rotate %8 by %c1_i32 dim 1 : vector<24x128xf32>, i32 -> vector<24x128xf32>
    %c127_i32 = arith.constant 127 : i32
    %10 = tpu.dynamic_rotate %8 by %c127_i32 dim 1 : vector<24x128xf32>, i32 -> vector<24x128xf32>
    %11 = arith.addf %9, %10 : vector<24x128xf32>
    %cst_5 = arith.constant 2.000000e+00 : f32
    %12 = vector.broadcast %cst_5 : f32 to vector<24x128xf32>
    %13 = arith.mulf %12, %8 : vector<24x128xf32>
    %14 = arith.addf %11, %13 : vector<24x128xf32>
    %c1_i32_6 = arith.constant 1 : i32
    %15 = tpu.dynamic_rotate %14 by %c1_i32_6 dim 0 : vector<24x128xf32>, i32 -> vector<24x128xf32>
    %c23_i32 = arith.constant 23 : i32
    %16 = tpu.dynamic_rotate %14 by %c23_i32 dim 0 : vector<24x128xf32>, i32 -> vector<24x128xf32>
    %17 = arith.subf %15, %16 : vector<24x128xf32>
    %18 = tpu.iota {dimensions = array<i32: 1>} : vector<1x128xi32>
    %c16_i32 = arith.constant 16 : i32
    %19 = vector.broadcast %c16_i32 : i32 to vector<1x128xi32>
    %20 = arith.cmpi slt, %18, %19 : vector<1x128xi32>
    %21 = vector.broadcast %2 : vector<24x1xi1> to vector<24x128xi1>
    %22 = vector.broadcast %20 : vector<1x128xi1> to vector<24x128xi1>
    %23 = arith.andi %21, %22 : vector<24x128xi1>
    %cst_7 = arith.constant 0.000000e+00 : f32
    %24 = vector.broadcast %cst_7 : f32 to vector<24x128xf32>
    %25 = arith.maximumf %3, %24 : vector<24x128xf32>
    %cst_8 = arith.constant 0.000000e+00 : f32
    %26 = vector.broadcast %cst_8 : f32 to vector<24x128xf32>
    %27 = arith.cmpf one, %17, %26 : vector<24x128xf32>
    %cst_9 = arith.constant 0.000000e+00 : f32
    %28 = vector.broadcast %cst_9 : f32 to vector<24x128xf32>
    %29 = arith.select %27, %3, %28 : vector<24x128xi1>, vector<24x128xf32>
    %30 = arith.subf %25, %29 : vector<24x128xf32>
    %31 = math.absf %3 : vector<24x128xf32>
    %cst_10 = arith.constant 0.000000e+00 : f32
    %32 = vector.broadcast %cst_10 : f32 to vector<24x128xf32>
    %33 = arith.subf %32, %31 : vector<24x128xf32>
    %34 = math.exp %33 : vector<24x128xf32>
    %cst_11 = arith.constant 1.000000e+00 : f32
    %35 = vector.broadcast %cst_11 : f32 to vector<24x128xf32>
    %36 = arith.addf %35, %34 : vector<24x128xf32>
    %37 = math.log %36 : vector<24x128xf32>
    %38 = arith.addf %30, %37 : vector<24x128xf32>
    %cst_12 = arith.constant 0.000000e+00 : f32
    %39 = vector.broadcast %cst_12 : f32 to vector<24x128xf32>
    %40 = arith.select %23, %38, %39 : vector<24x128xi1>, vector<24x128xf32>
    %41 = vector.shape_cast %40 : vector<24x128xf32> to vector<1x24x128xf32>
    %cst_13 = arith.constant dense<0.000000e+00> : vector<1xf32>
    %42 = vector.multi_reduction <add>, %41, %cst_13 [1, 2] : vector<1x24x128xf32> to vector<1xf32>
    %43 = vector.shape_cast %42 : vector<1xf32> to vector<1x1x1xf32>
    %44 = vector.extract %43[0, 0, 0] : f32 from vector<1x1x1xf32>
    %45 = tpu.iota {dimensions = array<i32: 0>} : vector<8x128xi32>
    %46 = tpu.iota {dimensions = array<i32: 1>} : vector<8x128xi32>
    %c0_i32_14 = arith.constant 0 : i32
    %47 = vector.broadcast %c0_i32_14 : i32 to vector<8x128xi32>
    %48 = arith.cmpi eq, %45, %47 : vector<8x128xi32>
    %c0_i32_15 = arith.constant 0 : i32
    %49 = vector.broadcast %c0_i32_15 : i32 to vector<8x128xi32>
    %50 = arith.cmpi eq, %46, %49 : vector<8x128xi32>
    %51 = arith.andi %48, %50 : vector<8x128xi1>
    %cst_16 = arith.constant 0.000000e+00 : f32
    %52 = vector.broadcast %44 : f32 to vector<8x128xf32>
    %53 = vector.broadcast %cst_16 : f32 to vector<8x128xf32>
    %54 = arith.select %51, %52, %53 : vector<8x128xi1>, vector<8x128xf32>
    %c0_17 = arith.constant 0 : index
    %c0_18 = arith.constant 0 : index
    %55 = vector.load %arg4[%c0_17, %c0_18] : memref<8x128xf32, #tpu.memory_space<vmem>>, vector<8x128xf32>
    tpu.vector_store %arg4[%c0_17, %c0_18], %54 {strides = array<i32>} : memref<8x128xf32, #tpu.memory_space<vmem>>, vector<8x128xf32>,
    return
  }
  func.func @transform_0(%arg0: i32) -> (i32, i32) {
    %c0_i32 = arith.constant 0 : i32
    %c0_i32_0 = arith.constant 0 : i32
    return %arg0, %c0_i32 : i32, i32
  }
  func.func @transform_1(%arg0: i32) -> (i32, i32) {
    %c0_i32 = arith.constant 0 : i32
    %c0_i32_0 = arith.constant 0 : i32
    return %arg0, %c0_i32 : i32, i32
  }
  func.func @transform_2(%arg0: i32) -> (i32, i32) {
    %c0_i32 = arith.constant 0 : i32
    %c0_i32_0 = arith.constant 0 : i32
    return %arg0, %c0_i32 : i32, i32
  }
  func.func @transform_3(%arg0: i32) -> (i32, i32) {
    %c0_i32 = arith.constant 0 : i32
    %c0_i32_0 = arith.constant 0 : i32
    return %arg0, %c0_i32 : i32, i32
  }
}

</mosaic_0001>

<bundles_post_ra>
// kernel: tpu_custom_call.1
= control target key start
LH: loop header
LB: loop body
LE: loop exit
PB: predicated region body
PF: predicated region fallthrough
CT: control target
= control target key end

     0   :  { %8 = vsyncpa [#allocation3], 0  ;;  %s913_s0 = inlined_call_operand.vmem [shape: s32[48,1], index: 0, kind: input, shape index: {}]   ;;  %s914_s1 = inlined_call_operand.vmem [shape: f32[48,128], index: 1, kind: input, shape index: {}]   ;;  %s915_s2 = inlined_call_operand.hbm [shape: f32[48,128], index: 2, kind: input, shape index: {}]   ;;  %s916_s3 = inlined_call_operand.hbm [shape: f32[16,128], index: 3, kind: output, shape index: {}]  }
   0x1   :  { %10 = vsyncpa [#allocation3 + $0x1], 0 }
   0x2   :  { %11 = vsyncpa [#allocation4], 0 }
   0x3   :  { %13 = vsyncpa [#allocation4 + $0x1], 0  ;;  %s683_s12 = smov 0   ;;  %s685_s13 = smov 0  }
   0x4   :  { %s687_s14 = smov 0   ;;  %s689_s15 = smov 0  }
   0x5 LB: > { %s704_s16 = sadd.s32 4294967295, %s654_s15   ;;  %s476_s17 = sadd.s32 4294967294, %s654_s15   ;;  %s654_s15 = sphi %s689_s15, %s928_s15   ;;  %s650_s14 = sphi %s687_s14, %s927_s14   ;;  %s646_s13 = sphi %s685_s13, %s926_s13   ;;  %s642_s12 = sphi %s683_s12, %s925_s12  }
   0x6   : > { %s708_s18 = sadd.s32 1, %s654_s15   ;;  %s78_s19 = sadd.s32 1, %s650_s14 }
   0x7   : > { %s75_s20 = ssub.s32 %s654_s15, %s708_s18  ;;  %p85_p0 = scmp.ne.s32.totalorder %s650_s14, %s646_s13 }
   0x8   : > { %p76_p1 = scmp.eq.s32.totalorder %s75_s20, 0  ;;  %p86_p2 = scmp.eq.s32.totalorder %s654_s15, 0 }
   0x9   : > { %p91_p3 = scmp.ne.s32.totalorder %s646_s13, %s642_s12  ;;  %p92_p4 = scmp.eq.s32.totalorder %s704_s16, 0 }
   0xa   : > { %s720_s21 = scalar_select %p76_p1, %s650_s14, %s78_s19  }
   0xb   : > { %p87_p5 = por %p86_p2, %p85_p0  ;;  %p722_p6 = por %p92_p4, %p91_p3 }
   0xc   : > { %p115_p7 = scmp.eq.s32.totalorder %s704_s16, 1  ;;  %p121_p8 = scmp.eq.s32.totalorder %s476_s17, 1 }
   0xd   : > { %p505_p10 = scmp.lt.s32.totalorder %s654_s15, 2  ;;  %s159_s25 = sand.u32 1, %s650_s14  }
   0xe   : > { %p729_p11 = por %p115_p7, %p85_p0  ;;  %p733_p12 = por %p121_p8, %p91_p3 }
   0xf   : > { %s488_s26 = smul.u32 384, %s654_s15  ;;  %p744_p13 = pnand %p505_p10, %p87_p5 }
  0x10   : > { %s919_s23 = scalar_select %p729_p11, 1, 0 }
  0x11   : > { %s920_s24 = scalar_select %p733_p12, 1, 0 }
  0x12   : > { %s489_s27 = smul.u32 24, %s159_s25  ;;  %s742_s30 = scalar_lea.hbm %s915_s2, %s488_s26 }
  0x13   : > { %s750_s7 = scalar_lea.sflag [#allocation3], %s159_s25  ;;  %s558_s8 = scalar_lea.hbm %s742_s30, 384 }
  0x14   : > { %s163_s5 = scalar_lea.vmem [#allocation2], %s489_s27  ;;  %p559_p0 = scmp.ne.s32.totalorder %s742_s30, %s558_s8 }
  0x15   : > { %s170_s6 = sshll.u32 %s163_s5, 4  ;;  %p560_p1 = pneg %p744_p13  ;;  %s748_s6 = int_to_ptr.vmem [resolvable:$true] %s170_s6 }
  0x16   : > { %s563_s11 = scalar_lea.hbm %s915_s2, 768  ;;  %p564_p4 = scmp.lt.u32.totalorder %s742_s30, %s915_s2 }
  0x17   : > { %p561_p2 = pnand %p560_p1, %p559_p0  ;;  %p565_p5 = scmp.lt.u32.totalorder %s563_s11, %s558_s8 }
  0x18   : > { %p567_p8 = scmp.lt.u32.totalorder %s558_s8, %s742_s30 }
  0x19   : > { %p562_p3 = pneg %p561_p2  ;;  %p566_p7 = por %p565_p5, %p564_p4 }
  0x1b   : > { %p568_p10 = por %p567_p8, %p566_p7 }
  0x1d   : > { %p569_p9 = pnand %p568_p10, %p562_p3 }
  0x1f   : > { %572 = shalt.err (!%p569_p9)
}
  0x20   : > { %s573_s20 = scalar_lea.vmem %s748_s6, 384  ;;  %s656_s25 = smov [#allocation2]  }
  0x21   : > { %p574_p0 = scmp.ne.s32.totalorder %s748_s6, %s573_s20  ;;  %s578_s26 = sshll.u32 %s656_s25, 4  ;;  %s579_s26 = int_to_ptr.vmem [resolvable:$false] %s578_s26 }
  0x22   : > { %s580_s27 = scalar_lea.vmem %s579_s26, 768  ;;  %p581_p11 = scmp.lt.s32.totalorder %s748_s6, %s579_s26 }
  0x23   : > { %p576_p2 = pnand %p574_p0, %p560_p1  ;;  %p582_p4 = scmp.lt.s32.totalorder %s580_s27, %s573_s20 }
  0x25   : > { %p577_p12 = pneg %p576_p2  ;;  %p583_p5 = por %p582_p4, %p581_p11 }
  0x27   : > { %p584_p7 = pnand %p583_p5, %p577_p12 }
  0x29   : > { %587 = shalt.err (!%p584_p7)
}
  0x2a   : > { %s657_s28 = smov 128   ;;  %s658_s29 = smov 8  }
  0x2b   : > { %500 = dma.hbm_to_vmem [thread:$0]  (!%p744_p13), %s742_s30, 384, %s748_s6, %s750_s7, %s657_s28, %s657_s28, %s658_s29  }
  0x2c   : > { %p480_p9 = scmp.ge.s32.totalorder %s654_s15, 1  ;;  %p178_p1 = scmp.lt.s32.totalorder %s654_s15, 3 }
  0x2e   : > { %p179_p3 = pnand %p480_p9, %p178_p1 }
  0x2f   : > { %s781_s5 = sand.u32 (!%p179_p3), 1, %s646_s13  }
  0x30   : > { %182 = sbr.rel (%p179_p3) target bundleno = 564 (0x234), region = 32  ;;  %s185_s9 = scalar_lea.sflag (!%p179_p3), [#allocation3], %s781_s5 }
  0x31   : > { %s490_s8 = smul.u32 (!%p179_p3), 24, %s781_s5 }
  0x33   : > { %s785_s10 = scalar_lea.vmem (!%p179_p3), [#allocation2], %s490_s8 }
  0x37   : > { %633 = dma.done.wait (%p722_p6), %s185_s9, 384  }
  0x38   : > { %635 = vsyncadd (%p722_p6), %s185_s9, 4294966912  ;;  %s221_s30 = smul.u32 3, %s704_s16  ;;  %v659_v0 = vmov 0   ;;  %v243_v7 = vld [vmem:[%s785_s10] sm:$0xff]  ;;  %v245_v9 = vld [vmem:[%s785_s10 + $0x10] sm:$0xff]  ;;  %s660_s22 = smov 1   ;;  %v288_v36 = vlaneseq }
  0x39   : > { %544 = vset.pattern.permute.xlu0 %v659_v0  ;;  %545 = vset.pattern.permute.xlu1 %v659_v0  ;;  %v244_v12 = vld [vmem:[%s785_s10 + $0x8] sm:$0xff]  ;;  %s661_s17 = smov 127   ;;  %s481_s26 = sshll.u32 %s781_s5, 3 }
  0x3a   : > { %p222_p11 = scmp.lt.s32.totalorder %s221_s30, 5  ;;  %v832_v38 = vshrl.u32 %v288_v36, 7  ;;  %v305_v58 = vand.u32 127, %v288_v36  ;;  %s485_s27 = sshll.u32 %s704_s16, 7 }
  0x3b   : > { %s220_s28 = scalar_lea.vmem [#allocation5], %s481_s26  ;;  %p922_p12 = scmp.ne.s32.totalorder %s919_s23, 0 }
  0x3c   : > { %s930_s30 = smov (!%p222_p11, %s221_s30), 5  ;;  %vm290_vm6 = vcmp.lt.s32.totalorder %v832_v38, 1  ;;  %vm297_vm7 = vcmp.lt.s32.totalorder %v832_v38, 7  ;;  %vm306_vm8 = vcmp.lt.s32.totalorder %v305_v58, 16  ;;  %vm362_vm15 = vcmp.eq.s32.totalorder %v832_v38, 0  ;;  %s382_s29 = sshll.u32 %s220_s28, 4  ;;  %s871_s29 = int_to_ptr.vmem [resolvable:$true] %s382_s29 }
  0x3d   : > { %s482_s4 = sshll.u32 %s930_s30, 3  ;;  %s869_s30 = scalar_lea.hbm %s916_s3, %s485_s27 }
  0x3e   : > { %s225_s11 = scalar_lea.vmem %s913_s0, %s482_s4  ;;  %s231_s25 = scalar_lea.vmem %s914_s1, %s482_s4 }
  0x3f   : > { %v234_v1 = vld [vmem:[%s225_s11] sm:$0xff]  ;;  %v236_v3 = vld [vmem:[%s225_s11 + $0x10] sm:$0xff]  ;;  %v235_v4 = vld [vmem:[%s225_s11 + $0x8] sm:$0xff]  ;;  %s369_s4 = scalar_lea.sflag [#allocation4], %s781_s5  ;;  %s588_s6 = scalar_lea.vmem %s871_s29, 128 }
  0x40   : > { %vm237_vm0 = vcmp.ne.s32.totalorder %v234_v1, 0  ;;  %vm239_vm1 = vcmp.ne.s32.totalorder %v236_v3, 0  ;;  %vm238_vm2 = vcmp.ne.s32.totalorder %v235_v4, 0  ;;  %v823_v16 = vld [vmem:[%s231_s25] sm:$0xff]  ;;  %v825_v17 = vld [vmem:[%s231_s25 + $0x8] sm:$0xff]  ;;  %v827_v18 = vld [vmem:[%s231_s25 + $0x10] sm:$0xff]  ;;  %p589_p6 = scmp.ne.s32.totalorder %s871_s29, %s588_s6 }
  0x41   : > { %v246_v2 = vsel %vm237_vm0, 1, %v659_v0  ;;  %v248_v5 = vsel %vm239_vm1, 1, %v659_v0  ;;  %v247_v6 = vsel %vm238_vm2, 1, %v659_v0  ;;  %v324_v19 = vand.u32 2147483647, %v823_v16  ;;  %s662_s16 = smov [#allocation5]  }
  0x42   : > { %250 = vperm.xlu0 %544, %v246_v2   ;;  %256 = vperm.xlu1 %545, %v248_v5   ;;  %v325_v20 = vand.u32 2147483647, %v825_v17  ;;  %v326_v21 = vand.u32 2147483647, %v827_v18  ;;  %v312_v62 = vmax.f32 %v823_v16, 0.0  ;;  %v313_v63 = vmax.f32 %v825_v17, 0.0  ;;  %p590_p13 = pnand %p589_p6, %p922_p12 }
  0x43   : > { %v327_v22 = vsub.f32 0.0, %v324_v19  ;;  %vm363_vm0 = vcmp.eq.s32.totalorder %v305_v58, 0  ;;  %s592_s7 = sshll.u32 %s662_s16, 4  ;;  %s593_s7 = int_to_ptr.vmem [resolvable:$false] %s592_s7 }
  0x44   : > { %v328_v23 = vsub.f32 0.0, %v325_v20  ;;  %v329_v24 = vsub.f32 0.0, %v326_v21  ;;  %vm364_vm1 = vmand %vm362_vm15, %vm363_vm0  ;;  %p591_p8 = pneg %p590_p13  ;;  %s594_s11 = scalar_lea.vmem %s593_s7, 256 }
  0x45   : > { %v330_v25 = vmul.f32 1.442695, %v327_v22  ;;  %p595_p10 = scmp.lt.s32.totalorder %s871_s29, %s593_s7  ;;  %p596_p0 = scmp.lt.s32.totalorder %s594_s11, %s588_s6 }
  0x46   : > { %253 = vperm.xlu0 %544, %v247_v6   ;;  %v332_v26 = vmul.f32 1.442695, %v328_v23  ;;  %v334_v27 = vmul.f32 1.442695, %v329_v24 }
  0x47   : > { %546 = vpow2.f32 %v330_v25  ;;  %p597_p2 = por %p596_p0, %p595_p10 }
  0x48   : > { %548 = vpow2.f32 %v332_v26 }
  0x49   : > { %550 = vpow2.f32 %v334_v27  ;;  %p598_p4 = pnand %p597_p2, %p591_p8 }
  0x51   : > { %v547_v29 = vpop.eup %546 }
  0x52   : > { %v549_v30 = vpop.eup %548  ;;  %v336_v34 = vadd.f32 1.0, %v547_v29 }
  0x53   : > { %v551_v31 = vpop.eup %550  ;;  %v337_v35 = vadd.f32 1.0, %v549_v30 }
  0x54   : > { %v338_v37 = vadd.f32 1.0, %v551_v31  ;;  %552 = vlog2.f32 %v336_v34 }
  0x55   : > { %554 = vlog2.f32 %v337_v35 }
  0x56   : > { %556 = vlog2.f32 %v338_v37 }
  0x5e   : > { %v553_v57 = vpop.eup %552 }
  0x5f   : > { %v555_v61 = vpop.eup %554 }
  0x60   : > { %v557_v0 = vpop.eup %556 }
  0xc1   : > { %v801_v8 = vpop.permute.xlu0 %250  ;;  %v807_v11 = vpop.permute.xlu1 %256 }
  0xc2   : > { %vm258_vm3 = vcmp.eq.s32.totalorder %v801_v8, 1  ;;  %vm260_vm4 = vcmp.eq.s32.totalorder %v807_v11, 1 }
  0xc3   : > { %v261_v10 = vsel %vm258_vm3, %v243_v7, 0.0  ;;  %v263_v13 = vsel %vm260_vm4, %v245_v9, 0.0  ;;  %v314_v9 = vmax.f32 %v827_v18, 0.0  ;;  %vm309_vm12 = vmand %vm258_vm3, %vm306_vm8 }
  0xc4   : > { %264 = vrot.lane.b32.xlu1 %v261_v10, %s660_s22  ;;  %v279_v39 = vmul.f32 2.0, %v261_v10  ;;  %v281_v52 = vmul.f32 2.0, %v263_v13  ;;  %vm311_vm13 = vmand %vm260_vm4, %vm306_vm8 }
  0xc5   : > { %v813_v14 = vpop.permute.xlu0 %253 }
  0xc6   : > { %vm259_vm5 = vcmp.eq.s32.totalorder %v813_v14, 1 }
  0xc7   : > { %v262_v15 = vsel %vm259_vm5, %v244_v12, 0.0  ;;  %v342_v12 = vmul.f32 0.6931472, %v555_v61  ;;  %vm310_vm14 = vmand %vm259_vm5, %vm306_vm8 }
  0xc8   : > { %268 = vrot.lane.b32.xlu1 %v263_v13, %s660_s22  ;;  %266 = vrot.lane.b32.xlu0 %v262_v15, %s660_s22  ;;  %v280_v42 = vmul.f32 2.0, %v262_v15 }
  0xcc   : > { %272 = vrot.lane.b32.xlu1 %v262_v15, %s661_s17  ;;  %270 = vrot.lane.b32.xlu0 %v261_v10, %s661_s17  ;;  %v340_v10 = vmul.f32 0.6931472, %v553_v57 }
  0xd0   : > { %274 = vrot.lane.b32.xlu0 %v263_v13, %s661_s17  ;;  %v344_v13 = vmul.f32 0.6931472, %v557_v0 }
 0x136   : > { %v265_v28 = vpop.permute.xlu1 %264 }
 0x13a   : > { %v269_v32 = vpop.permute.xlu1 %268  ;;  %v267_v33 = vpop.permute.xlu0 %266 }
 0x13e   : > { %v273_v40 = vpop.permute.xlu1 %272  ;;  %v271_v41 = vpop.permute.xlu0 %270 }
 0x13f   : > { %v277_v43 = vadd.f32 %v273_v40, %v267_v33  ;;  %v276_v44 = vadd.f32 %v271_v41, %v265_v28 }
 0x141   : > { %v283_v45 = vadd.f32 %v280_v42, %v277_v43  ;;  %v282_v46 = vadd.f32 %v279_v39, %v276_v44 }
 0x142   : > { %v275_v47 = vpop.permute.xlu0 %274 }
 0x143   : > { %v286_v48 = vrot.slane %v283_v45, 7  ;;  %v295_v49 = vrot.slane %v283_v45, 1  ;;  %v285_v50 = vrot.slane %v282_v46, 7  ;;  %v294_v51 = vrot.slane %v282_v46, 1 }
 0x144   : > { %v278_v53 = vadd.f32 %v275_v47, %v269_v32 }
 0x145   : > { %v292_v54 = vsel %vm290_vm6, %v285_v50, %v286_v48  ;;  %v299_v55 = vsel %vm297_vm7, %v294_v51, %v295_v49 }
 0x146   : > { %v284_v56 = vadd.f32 %v281_v52, %v278_v53 }
 0x148   : > { %v287_v59 = vrot.slane %v284_v56, 7  ;;  %v296_v60 = vrot.slane %v284_v56, 1 }
 0x14a   : > { %v291_v1 = vsel %vm290_vm6, %v286_v48, %v287_v59  ;;  %v293_v2 = vsel %vm290_vm6, %v287_v59, %v285_v50  ;;  %v298_v3 = vsel %vm297_vm7, %v295_v49, %v296_v60  ;;  %v300_v4 = vsel %vm297_vm7, %v296_v60, %v294_v51 }
 0x14b   : > { %v301_v5 = vsub.f32 %v293_v2, %v299_v55  ;;  %v302_v6 = vsub.f32 %v292_v54, %v298_v3  ;;  %v303_v7 = vsub.f32 %v291_v1, %v300_v4 }
 0x14d   : > { %vm315_vm9 = vcmp.ne.f32.partialorder %v301_v5, 0.0  ;;  %vm316_vm10 = vcmp.ne.f32.partialorder %v302_v6, 0.0  ;;  %vm317_vm11 = vcmp.ne.f32.partialorder %v303_v7, 0.0 }
 0x14e   : > { %v318_v15 = vsel %vm315_vm9, %v823_v16, 0.0  ;;  %v319_v19 = vsel %vm316_vm10, %v825_v17, 0.0  ;;  %v320_v20 = vsel %vm317_vm11, %v827_v18, 0.0 }
 0x14f   : > { %v321_v21 = vsub.f32 %v312_v62, %v318_v15  ;;  %v322_v22 = vsub.f32 %v313_v63, %v319_v19  ;;  %v323_v23 = vsub.f32 %v314_v9, %v320_v20 }
 0x151   : > { %v345_v24 = vadd.f32 %v340_v10, %v321_v21  ;;  %v346_v25 = vadd.f32 %v342_v12, %v322_v22  ;;  %v347_v26 = vadd.f32 %v344_v13, %v323_v23 }
 0x153   : > { %v348_v16 = vsel %vm309_vm12, %v345_v24, 0.0  ;;  %v349_v17 = vsel %vm310_vm14, %v346_v25, 0.0  ;;  %v350_v18 = vsel %vm311_vm13, %v347_v26, 0.0 }
 0x154   : > { %v351_v27 = vadd.f32 %v349_v17, %v348_v16 }
 0x156   : > { %v352_v28 = vadd.f32 %v351_v27, %v350_v18 }
 0x158   : > { %353 = vadd.xlane.f32.xlu1 %v352_v28 }
 0x1e5   : > { %v354_v8 = vpop.xlane.xlu1 %353 }
 0x1e6   : > { %v355_v29 = vrot.slane %v354_v8, 4 }
 0x1e8   : > { %v356_v30 = vadd.f32 %v355_v29, %v354_v8 }
 0x1ea   : > { %v357_v11 = vrot.slane %v356_v30, 2 }
 0x1ec   : > { %v358_v31 = vadd.f32 %v357_v11, %v356_v30 }
 0x1ee   : > { %v359_v32 = vrot.slane %v358_v31, 1 }
 0x1f0   : > { %v360_v33 = vadd.f32 %v359_v32, %v358_v31 }
 0x1f2   : > { %491 = vpush %v360_v33 }
 0x223   : > { %s492_s8 = spop %491 }
 0x224   : > { %v365_v14 = vstv %s492_s8 }
 0x225   : > { %v366_v34 = vsel %vm364_vm1, %v365_v14, 0.0 }
 0x226   : > { %367 = vst [vmem:[%s220_s28] sm:$0xff] %v366_v34 }
 0x227   : > { %601 = shalt.err (!%p598_p4)
}
 0x228   : > { %s602_s5 = scalar_lea.hbm %s869_s30, 128  ;;  %s606_s19 = scalar_lea.hbm %s916_s3, 256 }
 0x229   : > { %p603_p5 = scmp.ne.s32.totalorder %s869_s30, %s602_s5  ;;  %p607_p1 = scmp.lt.u32.totalorder %s869_s30, %s916_s3 }
 0x22a   : > { %p608_p3 = scmp.lt.u32.totalorder %s606_s19, %s602_s5  ;;  %p610_p6 = scmp.lt.u32.totalorder %s602_s5, %s869_s30 }
 0x22b   : > { %p604_p7 = pnand %p603_p5, %p922_p12 }
 0x22c   : > { %p609_p11 = por %p608_p3, %p607_p1 }
 0x22d   : > { %p605_p9 = pneg %p604_p7 }
 0x22e   : > { %p611_p13 = por %p610_p6, %p609_p11 }
 0x230   : > { %p612_p8 = pnand %p611_p13, %p605_p9 }
 0x232   : > { %615 = shalt.err (!%p612_p8)
}
 0x233   : > { %495 = dma.vmem_to_hbm [thread:$0]  (%p922_p12), %s871_s29, 128, %s869_s30, %s369_s4  }
 0x234 PF: > { %s394_s26 = sand.u32 1, %s642_s12   ;;  %p923_p10 = scmp.ne.s32.totalorder %s920_s24, 0 }
 0x235   : > { %p924_p0 = scmp.ge.s32.totalorder %s654_s15, 2  ;;  %s395_s27 = scalar_lea.sflag [#allocation4], %s394_s26 }
 0x237   : > { %p502_p2 = pnand %p924_p0, %p923_p10 }
 0x239   : > { %637 = dma.done.wait (!%p502_p2), %s395_s27, 128  }
 0x23a   : > { %639 = vsyncadd (!%p502_p2), %s395_s27, 4294967168  ;;  %p16_p4 = scmp.ge.s32.totalorder %s708_s18, 4   ;;  %s925_s12 = smov %s646_s13 }
 0x23b   : > { %s926_s13 = smov %s650_s14  ;;  %s927_s14 = smov %s720_s21 }
 0x23c   : > { %s928_s15 = smov %s708_s18  ;;  %18 = sbr.rel (!%p16_p4) target bundleno = 5 (0x5), region = 83 }
 0x243   :  { %400 = vsyncpa [#allocation3], 1 }
 0x244   :  { %402 = vsyncpa [#allocation3 + $0x1], 1 }
 0x245   :  { %403 = vsyncpa [#allocation4], 1 }
 0x246   :  { %405 = vsyncpa [#allocation4 + $0x1], 1 }

</bundles_post_ra>
